<compile_context>
chip_gen: v5e
topology: v5e:2x2
jax: 0.10.0
libtpu: 0.0.40
codegen_flags: <defaults>
</compile_context>

<pallas_src>
import functools

import jax
import jax.numpy as jnp
from jax import lax
from jax.experimental import pallas as pl
from jax.experimental.pallas import tpu as pltpu

V_THRESHOLD = 1.0
V_RESET = 0.0
INIT_W = -0.001   # RIFNode.__init__ default: nn.Parameter(torch.tensor([init_w]))

_LANE = 128
_DEFAULT_T_BLOCK = 8
_MAX_T_BLOCK = 32
_VMEM_BUDGET_BYTES = 12 * 1024 * 1024   # streamed working-set target (fits v5e/v6e/v7x)
_VMEM_LIMIT_BYTES = 32 * 1024 * 1024    # requested scoped-VMEM limit


def _round_up(x, m):
    return -(-x // m) * m


def _sublane(dtype):
    # Sub-32-bit dtypes pack along sublanes: (8,128) f32, (16,128) bf16, (32,128) int8.
    return max(8, 32 // jnp.dtype(dtype).itemsize)


def _rif_kernel(w_ref, v0_ref, dv_ref, spike_ref, v_out_ref, *,
                v_threshold, v_reset, t_block, t_total):
    """One (block_rows, 128) tile, t_block fused time steps.

    The membrane potential is carried in the resident v_out output block
    (same block index across the t grid axis).
    """
    tb = pl.program_id(1)

    @pl.when(tb == 0)
    def _init():
        v_out_ref[...] = v0_ref[...]

    w = w_ref[0]                                   # scalar read from SMEM
    need_tail_mask = (t_total % t_block) != 0      # static Python bool

    def step(s, v):
        dv = dv_ref[s]
        if v_reset == 0.0:                         # static branch: skip the subtract
            v_new = v * w + dv
        else:
            v_new = (v - v_reset) * w + dv
        mask = v_new >= v_threshold
        spike_ref[s] = mask.astype(spike_ref.dtype)
        v_next = jnp.where(mask, jnp.full_like(v_new, v_reset), v_new)
        if need_tail_mask:
            valid = tb * t_block + s < t_total     # freeze carry on padded steps
            v_next = jnp.where(valid, v_next, v)
        return v_next

    v_out_ref[...] = lax.fori_loop(0, t_block, step, v_out_ref[...], unroll=True)


def rif_forward_seq(w, v, dv_seq, *, v_threshold=V_THRESHOLD, v_reset=V_RESET,
                    spike_dtype=None):
    """Run T fused RIFNode steps.

    Args:
      w:           scalar (or shape-(1,)) self-connection weight.
      v:           initial membrane potential, shape = dv_seq.shape[1:].
      dv_seq:      voltage increments, shape [T, ...] (or [...] for one step).
      spike_dtype: optional narrower dtype for the spike output (e.g. jnp.int8)
                   to cut HBM writeback traffic; defaults to dv's dtype.

    Returns:
      (spikes, v_out): spikes has shape [T, ...] (or [...] if single step),
      v_out is the final membrane potential (same shape as v).
    """
    assert isinstance(v_threshold, (int, float)) and isinstance(v_reset, (int, float)), (
        "v_threshold / v_reset must be static Python scalars")
    dv_seq = jnp.asarray(dv_seq)
    v = jnp.asarray(v)
    single_step = dv_seq.ndim == v.ndim
    if single_step:
        dv_seq = dv_seq[None]
    T = dv_seq.shape[0]
    orig_shape = dv_seq.shape[1:]
    assert v.shape == orig_shape and v.dtype == dv_seq.dtype
    dtype = dv_seq.dtype
    spike_dtype = jnp.dtype(dtype if spike_dtype is None else spike_dtype)
    n = v.size

    isize_v = jnp.dtype(dtype).itemsize
    isize_dv = isize_v
    isize_sp = spike_dtype.itemsize
    sub = max(_sublane(dtype), _sublane(spike_dtype))

    rows = -(-n // _LANE)
    base = _round_up(rows, sub)

    def _rows_cap(tb):
        # double-buffered dv + spikes streams, plus v0 + v_out (resident) blocks
        per_row = 2 * _LANE * (tb * (isize_dv + isize_sp) + 2 * isize_v)
        return max(sub, (_VMEM_BUDGET_BYTES // per_row) // sub * sub)

    t_block = max(1, min(T, _DEFAULT_T_BLOCK))
    cap = _rows_cap(t_block)
    if base <= cap:
        # Small-N case: grow the time block to amortize more grid-step overhead.
        avail = _VMEM_BUDGET_BYTES // (2 * _LANE * base) - 2 * isize_v
        tb_fit = max(1, avail // (isize_dv + isize_sp))
        t_block = int(min(T, _MAX_T_BLOCK, max(t_block, tb_fit)))
        cap = _rows_cap(t_block)

    block_rows = min(base, cap)
    if block_rows >= base and base >= 2 * sub:
        # Whole tensor fits one row block: split so the "parallel" row axis
        # can shard across both v7x TensorCores.
        block_rows = _round_up(-(-base // 2), sub)

    padded_rows = _round_up(rows, block_rows)
    num_blocks = padded_rows // block_rows
    t_pad = _round_up(T, t_block)
    num_tblocks = t_pad // t_block

    pad_n = padded_rows * _LANE - n
    pad_t = t_pad - T

    v_flat = v.reshape(-1)
    dv_flat = dv_seq.reshape(T, -1)
    if pad_n:
        v_flat = jnp.pad(v_flat, (0, pad_n), constant_values=v_reset)
        dv_flat = jnp.pad(dv_flat, ((0, 0), (0, pad_n)))
    if pad_t:
        dv_flat = jnp.pad(dv_flat, ((0, pad_t), (0, 0)))
    v_flat = v_flat.reshape(padded_rows, _LANE)
    dv_flat = dv_flat.reshape(t_pad, padded_rows, _LANE)

    w_arr = jnp.asarray(w, dtype=dtype).reshape(1)

    kernel = functools.partial(
        _rif_kernel, v_threshold=float(v_threshold), v_reset=float(v_reset),
        t_block=t_block, t_total=T)

    grid_spec = pltpu.PrefetchScalarGridSpec(
        num_scalar_prefetch=0,
        grid=(num_blocks, num_tblocks),
        in_specs=[
            # scalar self-connection weight: whole (1,) array, kept in SMEM
            pl.BlockSpec(memory_space=pltpu.MemorySpace.SMEM),
            # initial membrane potential: same block across t -> DMA'd once per row block
            pl.BlockSpec((block_rows, _LANE), lambda i, t: (i, 0)),
            # per-time-block input increments
            pl.BlockSpec((t_block, block_rows, _LANE), lambda i, t: (t, i, 0)),
        ],
        out_specs=(
            # per-time-block spikes streamed out
            pl.BlockSpec((t_block, block_rows, _LANE), lambda i, t: (t, i, 0)),
            # final membrane potential: resident across t (also the carry)
            pl.BlockSpec((block_rows, _LANE), lambda i, t: (i, 0)),
        ),
    )

    cost = pl.CostEstimate(
        flops=5 * T * n,
        transcendentals=0,
        bytes_accessed=T * n * (isize_dv + isize_sp) + 2 * n * isize_v,
    )

    spikes_flat, v_out_flat = pl.pallas_call(
        kernel,
        out_shape=(
            jax.ShapeDtypeStruct((t_pad, padded_rows, _LANE), spike_dtype),
            jax.ShapeDtypeStruct((padded_rows, _LANE), dtype),
        ),
        grid_spec=grid_spec,
        compiler_params=pltpu.CompilerParams(
            dimension_semantics=("parallel", "arbitrary"),
            vmem_limit_bytes=_VMEM_LIMIT_BYTES,
        ),
        cost_estimate=cost,
    )(w_arr, v_flat, dv_flat)

    spikes = spikes_flat.reshape(t_pad, -1)[:T, :n].reshape((T,) + orig_shape)
    v_out = v_out_flat.reshape(-1)[:n].reshape(orig_shape)

    if single_step:
        spikes = spikes[0]
    return spikes, v_out


def rif_forward(w, v, dv, *, v_threshold=V_THRESHOLD, v_reset=V_RESET):
    """Single RIFNode step (API parity with the PyTorch module's forward)."""
    return rif_forward_seq(w, v, dv, v_threshold=v_threshold, v_reset=v_reset)


def _rif_forward_ref(w, v, dv, *, v_threshold=V_THRESHOLD, v_reset=V_RESET):
    """Pure-JAX reference mirroring the PyTorch module (one step)."""
    v_new = (v - v_reset) * w + dv
    spike = (v_new >= v_threshold).astype(dv.dtype)
    v_out = v_new * (1.0 - spike) + v_reset * spike
    return spike, v_out


if __name__ == "__main__":
    key = jax.random.PRNGKey(0)
    B, C, H, W = 2, 4, 16, 16   # layout: NCHW, as in the PyTorch module
    T = 2                       # fused time steps

    # Deterministic parameter init (from RIFNode.__init__ defaults).
    w_param = jnp.array([INIT_W], dtype=jnp.float32)

    # Initial membrane potential: v = v_reset everywhere.
    v_state0 = jnp.full((B, C, H, W), V_RESET, dtype=jnp.float32)

    # T time steps of input voltage increments (scaled so some neurons spike).
    dv_seq = jax.random.uniform(key, (T, B, C, H, W), dtype=jnp.float32) * 2.0

    # Fused multi-step kernel run.
    spikes, v_final = rif_forward_seq(w_param[0], v_state0, dv_seq)
    jax.block_until_ready((spikes, v_final))

    # Single-step path.
    spike1_single, v1_single = rif_forward(w_param[0], v_state0, dv_seq[0])
    jax.block_until_ready((spike1_single, v1_single))

    # Narrow spike-dtype path (int8 spikes, f32 membrane state).
    spikes_i8, v_i8 = rif_forward_seq(w_param[0], v_state0, dv_seq, spike_dtype=jnp.int8)
    jax.block_until_ready((spikes_i8, v_i8))

    # Pure-JAX reference (sequential loop).
    v_ref = v_state0
    ref_spikes = []
    for t in range(T):
        s_ref, v_ref = _rif_forward_ref(w_param[0], v_ref, dv_seq[t])
        ref_spikes.append(s_ref)
    ref_spikes = jnp.stack(ref_spikes)

    assert jnp.array_equal(spikes, ref_spikes), "spike mismatch (fused)"
    assert jnp.allclose(v_final, v_ref, atol=1e-6), "v mismatch (fused)"
    assert jnp.array_equal(spike1_single, ref_spikes[0]), "spike mismatch (single step)"
    rs1, rv1 = _rif_forward_ref(w_param[0], v_state0, dv_seq[0])
    assert jnp.allclose(v1_single, rv1, atol=1e-6), "v mismatch (single step)"
    assert jnp.array_equal(spikes_i8.astype(jnp.float32), ref_spikes), "spike mismatch (int8)"
    assert jnp.allclose(v_i8, v_ref, atol=1e-6), "v mismatch (int8 spikes)"

    # Long-T / small-N case: exercises time blocking (Tb=32) + tail masking.
    T2, shp2 = 37, (4, 32)
    v0_2 = jnp.full(shp2, V_RESET, dtype=jnp.float32)
    dv2 = jax.random.uniform(jax.random.PRNGKey(1), (T2,) + shp2, dtype=jnp.float32) * 2.0
    sp2, vf2 = rif_forward_seq(w_param[0], v0_2, dv2)
    jax.block_until_ready((sp2, vf2))
    v_r2 = v0_2
    ref2 = []
    for t in range(T2):
        s_r, v_r2 = _rif_forward_ref(w_param[0], v_r2, dv2[t])
        ref2.append(s_r)
    ref2 = jnp.stack(ref2)
    assert jnp.array_equal(sp2, ref2), "spike mismatch (long-T)"
    assert jnp.allclose(vf2, v_r2, atol=1e-6), "v mismatch (long-T)"

    print("KERNEL_OK")
</pallas_src>

<mosaic_0001>
module attributes {stable_mosaic.version = 11 : i64} {
  func.func @_rif_kernel(%arg0: i32, %arg1: i32, %arg2: memref<1xf32, #tpu.memory_space<smem>>, %arg3: memref<8x128xf32, #tpu.memory_space<vmem>>, %arg4: memref<2x8x128xf32, #tpu.memory_space<vmem>>, %arg5: memref<2x8x128xf32, #tpu.memory_space<vmem>>, %arg6: memref<8x128xf32, #tpu.memory_space<vmem>>) attributes {dimension_semantics = [#tpu.dimension_semantics<parallel>, #tpu.dimension_semantics<arbitrary>], iteration_bounds = array<i64: 2, 1>, scalar_prefetch = 0 : i64, scratch_operands = 0 : i64, tpu.core_type = #tpu.core_type<tc>, window_params = [{transform_indices = @transform_0, window_bounds = array<i64: 1>}, {transform_indices = @transform_1, window_bounds = array<i64: 8, 128>}, {transform_indices = @transform_2, window_bounds = array<i64: 2, 8, 128>}, {transform_indices = @transform_3, window_bounds = array<i64: 2, 8, 128>}, {transform_indices = @transform_4, window_bounds = array<i64: 8, 128>}]} {
    %c0_i32 = arith.constant 0 : i32
    %0 = arith.cmpi eq, %arg1, %c0_i32 : i32
    %1 = arith.extui %0 : i1 to i32
    %c0_i32_0 = arith.constant 0 : i32
    %2 = arith.cmpi ne, %1, %c0_i32_0 : i32
    scf.if %2 {
      %c0_17 = arith.constant 0 : index
      %c0_18 = arith.constant 0 : index
      %38 = vector.load %arg3[%c0_17, %c0_18] : memref<8x128xf32, #tpu.memory_space<vmem>>, vector<8x128xf32>
      %c0_19 = arith.constant 0 : index
      %c0_20 = arith.constant 0 : index
      %39 = vector.load %arg6[%c0_19, %c0_20] : memref<8x128xf32, #tpu.memory_space<vmem>>, vector<8x128xf32>
      tpu.vector_store %arg6[%c0_19, %c0_20], %38 {strides = array<i32>} : memref<8x128xf32, #tpu.memory_space<vmem>>, vector<8x128xf32>,
    } else {
    }
    %c0 = arith.constant 0 : index
    %3 = memref.load %arg2[%c0] : memref<1xf32, #tpu.memory_space<smem>>
    %c0_1 = arith.constant 0 : index
    %c0_2 = arith.constant 0 : index
    %4 = vector.load %arg6[%c0_1, %c0_2] : memref<8x128xf32, #tpu.memory_space<vmem>>, vector<8x128xf32>
    %c0_i32_3 = arith.constant 0 : i32
    %5 = arith.index_cast %c0_i32_3 : i32 to index
    %c0_4 = arith.constant 0 : index
    %c0_5 = arith.constant 0 : index
    %6 = vector.load %arg4[%5, %c0_4, %c0_5] : memref<2x8x128xf32, #tpu.memory_space<vmem>>, vector<1x8x128xf32>
    %7 = vector.shape_cast %6 : vector<1x8x128xf32> to vector<8x128xf32>
    %8 = vector.broadcast %3 : f32 to vector<8x128xf32>
    %9 = arith.mulf %4, %8 : vector<8x128xf32>
    %10 = arith.addf %9, %7 : vector<8x128xf32>
    %cst = arith.constant 1.000000e+00 : f32
    %11 = vector.broadcast %cst : f32 to vector<8x128xf32>
    %12 = arith.cmpf oge, %10, %11 : vector<8x128xf32>
    %13 = arith.extui %12 : vector<8x128xi1> to vector<8x128xi32>
    %14 = arith.sitofp %13 : vector<8x128xi32> to vector<8x128xf32>
    %15 = arith.index_cast %c0_i32_3 : i32 to index
    %c0_6 = arith.constant 0 : index
    %c0_7 = arith.constant 0 : index
    %16 = vector.load %arg5[%15, %c0_6, %c0_7] : memref<2x8x128xf32, #tpu.memory_space<vmem>>, vector<1x8x128xf32>
    %17 = vector.shape_cast %16 : vector<1x8x128xf32> to vector<8x128xf32>
    %18 = vector.shape_cast %14 : vector<8x128xf32> to vector<1x8x128xf32>
    tpu.vector_store %arg5[%15, %c0_6, %c0_7], %18 {strides = array<i32>} : memref<2x8x128xf32, #tpu.memory_space<vmem>>, vector<1x8x128xf32>,
    %cst_8 = arith.constant 0.000000e+00 : f32
    %19 = vector.broadcast %cst_8 : f32 to vector<8x128xf32>
    %20 = arith.select %12, %19, %10 : vector<8x128xi1>, vector<8x128xf32>
    %c1_i32 = arith.constant 1 : i32
    %21 = arith.index_cast %c1_i32 : i32 to index
    %c0_9 = arith.constant 0 : index
    %c0_10 = arith.constant 0 : index
    %22 = vector.load %arg4[%21, %c0_9, %c0_10] : memref<2x8x128xf32, #tpu.memory_space<vmem>>, vector<1x8x128xf32>
    %23 = vector.shape_cast %22 : vector<1x8x128xf32> to vector<8x128xf32>
    %24 = vector.broadcast %3 : f32 to vector<8x128xf32>
    %25 = arith.mulf %20, %24 : vector<8x128xf32>
    %26 = arith.addf %25, %23 : vector<8x128xf32>
    %cst_11 = arith.constant 1.000000e+00 : f32
    %27 = vector.broadcast %cst_11 : f32 to vector<8x128xf32>
    %28 = arith.cmpf oge, %26, %27 : vector<8x128xf32>
    %29 = arith.extui %28 : vector<8x128xi1> to vector<8x128xi32>
    %30 = arith.sitofp %29 : vector<8x128xi32> to vector<8x128xf32>
    %31 = arith.index_cast %c1_i32 : i32 to index
    %c0_12 = arith.constant 0 : index
    %c0_13 = arith.constant 0 : index
    %32 = vector.load %arg5[%31, %c0_12, %c0_13] : memref<2x8x128xf32, #tpu.memory_space<vmem>>, vector<1x8x128xf32>
    %33 = vector.shape_cast %32 : vector<1x8x128xf32> to vector<8x128xf32>
    %34 = vector.shape_cast %30 : vector<8x128xf32> to vector<1x8x128xf32>
    tpu.vector_store %arg5[%31, %c0_12, %c0_13], %34 {strides = array<i32>} : memref<2x8x128xf32, #tpu.memory_space<vmem>>, vector<1x8x128xf32>,
    %cst_14 = arith.constant 0.000000e+00 : f32
    %35 = vector.broadcast %cst_14 : f32 to vector<8x128xf32>
    %36 = arith.select %28, %35, %26 : vector<8x128xi1>, vector<8x128xf32>
    %c2_i32 = arith.constant 2 : i32
    %c0_15 = arith.constant 0 : index
    %c0_16 = arith.constant 0 : index
    %37 = vector.load %arg6[%c0_15, %c0_16] : memref<8x128xf32, #tpu.memory_space<vmem>>, vector<8x128xf32>
    tpu.vector_store %arg6[%c0_15, %c0_16], %36 {strides = array<i32>} : memref<8x128xf32, #tpu.memory_space<vmem>>, vector<8x128xf32>,
    return
  }
  func.func @transform_0(%arg0: i32, %arg1: i32) -> i32 {
    %c0_i32 = arith.constant 0 : i32
    %c0_i32_0 = arith.constant 0 : i32
    return %c0_i32 : i32
  }
  func.func @transform_1(%arg0: i32, %arg1: i32) -> (i32, i32) {
    %c0_i32 = arith.constant 0 : i32
    %c0_i32_0 = arith.constant 0 : i32
    return %arg0, %c0_i32 : i32, i32
  }
  func.func @transform_2(%arg0: i32, %arg1: i32) -> (i32, i32, i32) {
    %c0_i32 = arith.constant 0 : i32
    %c0_i32_0 = arith.constant 0 : i32
    return %arg1, %arg0, %c0_i32 : i32, i32, i32
  }
  func.func @transform_3(%arg0: i32, %arg1: i32) -> (i32, i32, i32) {
    %c0_i32 = arith.constant 0 : i32
    %c0_i32_0 = arith.constant 0 : i32
    return %arg1, %arg0, %c0_i32 : i32, i32, i32
  }
  func.func @transform_4(%arg0: i32, %arg1: i32) -> (i32, i32) {
    %c0_i32 = arith.constant 0 : i32
    %c0_i32_0 = arith.constant 0 : i32
    return %arg0, %c0_i32 : i32, i32
  }
}

</mosaic_0001>

<bundles_post_ra>
// kernel: tpu_custom_call.1
= control target key start
LH: loop header
LB: loop body
LE: loop exit
PB: predicated region body
PF: predicated region fallthrough
CT: control target
= control target key end

     0   :  { %s983_s0 = inlined_call_operand.<no memory space> [shape: f32[1], index: 0, kind: input, shape index: {}]   ;;  %s984_s1 = inlined_call_operand.hbm [shape: f32[16,128], index: 1, kind: input, shape index: {}]   ;;  %s985_s2 = inlined_call_operand.hbm [shape: f32[2,16,128], index: 2, kind: input, shape index: {}]   ;;  %s986_s3 = inlined_call_operand.hbm [shape: f32[2,16,128], index: 3, kind: output, shape index: {0}]   ;;  %s987_s4 = inlined_call_operand.hbm [shape: f32[16,128], index: 4, kind: output, shape index: {1}]  }
   0x1   :  { %988 = sst [smem:[#allocation15_spill]] %s984_s1 }
   0x2   :  { %10 = sst [smem:[#allocation2]] %s983_s0 }
   0x3   :  { %11 = vsyncpa [#allocation4], 0 }
   0x4   :  { %13 = vsyncpa [#allocation4 + $0x1], 0 }
   0x5   :  { %14 = vsyncpa [#allocation7], 0 }
   0x6   :  { %16 = vsyncpa [#allocation7 + $0x1], 0 }
   0x7   :  { %17 = vsyncpa [#allocation5], 0 }
   0x8   :  { %19 = vsyncpa [#allocation5 + $0x1], 0 }
   0x9   :  { %20 = vsyncpa [#allocation10], 0 }
   0xa   :  { %22 = vsyncpa [#allocation10 + $0x1], 0  ;;  %s812_s17 = smov 0   ;;  %s814_s18 = smov 0  }
   0xb   :  { %s816_s19 = smov 0   ;;  %s818_s20 = smov 0  }
   0xc   :  { %s820_s21 = smov 0   ;;  %s822_s22 = smov 0  }
   0xd LB: > { %s495_s0 = sadd.s32 4294967295, %s775_s22   ;;  %s496_s23 = sadd.s32 4294967294, %s775_s22   ;;  %s775_s22 = sphi %s822_s22, %s28_s22   ;;  %s771_s21 = sphi %s820_s21, %s999_s21   ;;  %s767_s20 = sphi %s818_s20, %s998_s20   ;;  %s763_s19 = sphi %s816_s19, %s997_s19   ;;  %s759_s18 = sphi %s814_s18, %s996_s18   ;;  %s755_s17 = sphi %s812_s17, %s995_s17  }
   0xe   : > { %s40_s24 = sadd.s32 1, %s771_s21  ;;  %s68_s25 = sadd.s32 1, %s763_s19 }
   0xf   : > { %p42_p0 = scmp.ge.s32.totalorder %s40_s24, 2  ;;  %p75_p1 = scmp.ne.s32.totalorder %s763_s19, %s759_s18 }
  0x10   : > { %p76_p2 = scmp.eq.s32.totalorder %s775_s22, 0  ;;  %p81_p3 = scmp.ne.s32.totalorder %s759_s18, %s755_s17 }
  0x11   : > { %s1001_s24 = smov (%p42_p0, %s40_s24), 0  ;;  %p82_p5 = scmp.eq.s32.totalorder %s495_s0, 0 }
  0x12   : > { %p853_p4 = por %p76_p2, %p75_p1  ;;  %s65_s27 = ssub.s32 %s771_s21, %s1001_s24 }
  0x13   : > { %p135_p6 = scmp.eq.s32.totalorder %s495_s0, 1  ;;  %p66_p7 = scmp.eq.s32.totalorder %s65_s27, 0 }
  0x14   : > { %p859_p8 = por %p82_p5, %p81_p3  ;;  %p141_p10 = scmp.eq.s32.totalorder %s496_s23, 1 }
  0x15   : > { %p863_p9 = por %p135_p6, %p75_p1  ;;  %p498_p12 = scmp.ge.s32.totalorder %s775_s22, 2 }
  0x16   : > { %s868_s30 = scalar_select %p66_p7, %s763_s19, %s68_s25  }
  0x17   : > { %p870_p11 = por %p141_p10, %p81_p3  ;;  %p540_p13 = scmp.lt.s32.totalorder %s775_s22, 2 }
  0x18   : > { %s877_s6 = sand.u32 1, %s763_s19   ;;  %s500_s8 = sshll.u32 %s771_s21, 3 }
  0x19   : > { %s499_s7 = sshll.u32 %s877_s6, 3  ;;  %s993_s1 = sld [smem:[#allocation15_spill]] }
  0x1a   : > { %s194_s12 = scalar_lea.vmem [#allocation3], %s499_s7  ;;  %p886_p0 = pnand %p540_p13, %p853_p4 }
  0x1b   : > { %s202_s13 = sshll.u32 %s194_s12, 4  ;;  %s501_s16 = sshll.u32 %s877_s6, 4  ;;  %s203_s13 = int_to_ptr.vmem [resolvable:$true] %s202_s13 }
  0x1c   : > { %s191_s0 = scalar_lea.sflag [#allocation4], %s877_s6  ;;  %s220_s27 = scalar_lea.hbm %s985_s2, %s500_s8 }
  0x1d   : > { %p503_p1 = scmp.ge.s32.totalorder %s775_s22, 1  ;;  %s221_s7 = sshll.u32 %s220_s27, 4  ;;  %s222_s7 = int_to_ptr.hbm [resolvable:$true] %s221_s7 }
  0x1e   : > { %p231_p2 = scmp.lt.s32.totalorder %s775_s22, 3  ;;  %s213_s9 = scalar_lea.vmem [#allocation6], %s501_s16 }
  0x1f   : > { %s198_s11 = scalar_lea.hbm %s993_s1, %s500_s8  ;;  %s223_s26 = sshll.u32 %s213_s9, 4  ;;  %s224_s26 = int_to_ptr.vmem [resolvable:$true] %s223_s26 }
  0x20   : > { %s200_s14 = sshll.u32 %s198_s11, 4  ;;  %p232_p3 = pnand %p503_p1, %p231_p2  ;;  %s201_s14 = int_to_ptr.hbm [resolvable:$true] %s200_s14 }
  0x21   : > { %529 = dma.hbm_to_vmem [thread:$0]  (!%p886_p0), %s201_s14, 128, %s203_s13, %s191_s0  }
  0x22   : > { %s210_s10 = scalar_lea.sflag [#allocation7], %s877_s6  ;;  %s777_s11 = smov 256  }
  0x23   : > { %s778_s12 = smov 128   ;;  %s779_s1 = smov 8  }
  0x24   : > { %532 = dma.hbm_to_vmem [thread:$0]  (!%p886_p0), %s222_s7, 256, %s224_s26, %s210_s10, %s777_s11, %s778_s12, %s779_s1  }
  0x25   : > { %235 = sbr.rel (%p232_p3) target bundleno = 83 (0x53), region = 32  ;;  %s903_s13 = sand.u32 (!%p232_p3), 1, %s759_s18  }
  0x26   : > { %s504_s8 = sshll.u32 (!%p232_p3), %s903_s13, 3  ;;  %s238_s14 = scalar_lea.sflag (!%p232_p3), [#allocation4], %s903_s13 }
  0x27   : > { %s241_s16 = scalar_lea.vmem (!%p232_p3), [#allocation3], %s504_s8 }
  0x2a   : > { %738 = dma.done.wait (%p859_p8), %s238_s14, 128  }
  0x2b   : > { %740 = vsyncadd (%p859_p8), %s238_s14, 4294967168  ;;  %s505_s1 = sshll.u32 %s903_s13, 4  ;;  %s248_s6 = scalar_lea.sflag [#allocation7], %s903_s13 }
  0x2c   : > { %s251_s15 = scalar_lea.vmem [#allocation6], %s505_s1 }
  0x2d   : > { %742 = dma.done.wait (%p859_p8), %s248_s6, 256  }
  0x2e   : > { %744 = vsyncadd (%p859_p8), %s248_s6, 4294967040  ;;  %s295_s0 = sld [smem:[#allocation2]]  ;;  %v293_v0 = vld [vmem:[%s241_s16] sm:$0xff]  ;;  %v297_v1 = vld [vmem:[%s251_s15] sm:$0xff]  ;;  %s514_s23 = sshll.u32 %s767_s20, 3  ;;  %v780_v5 = vmov 0.0  }
  0x2f   : > { %s279_s25 = scalar_lea.vmem [#allocation8], %s505_s1  ;;  %v509_v8 = vld [vmem:[%s251_s15 + $0x8] sm:$0xff]  ;;  %s336_s28 = scalar_lea.hbm %s986_s3, %s514_s23 }
  0x30   : > { %s337_s27 = sshll.u32 %s279_s25, 4  ;;  %s352_s11 = scalar_lea.hbm %s987_s4, %s514_s23  ;;  %s926_s27 = int_to_ptr.vmem [resolvable:$true] %s337_s27 }
  0x31   : > { %s339_s20 = sshll.u32 %s336_s28, 4  ;;  %s286_s12 = scalar_lea.vmem [#allocation9], %s504_s8  ;;  %s340_s20 = int_to_ptr.hbm [resolvable:$true] %s339_s20 }
  0x32   : > { %s354_s14 = sshll.u32 %s286_s12, 4  ;;  %s356_s16 = sshll.u32 %s352_s11, 4  ;;  %s930_s14 = int_to_ptr.vmem [resolvable:$true] %s354_s14  ;;  %s932_s16 = int_to_ptr.hbm [resolvable:$true] %s356_s16 }
  0x33   : > { %s318_s1 = scalar_lea.sflag [#allocation5], %s903_s13  ;;  %s671_s6 = sshra.s32 %s340_s20, 4  ;;  %s672_s6 = int_to_ptr.hbm [resolvable:$true] %s671_s6 }
  0x34   : > { %v298_v2 = vstv %s295_s0  ;;  %s673_s15 = scalar_lea.hbm %s672_s6, 16  ;;  %s677_s23 = scalar_lea.hbm %s986_s3, 32 }
  0x35   : > { %v299_v3 = vmul.f32 %v298_v2, %v293_v0  ;;  %p674_p4 = scmp.ne.s32.totalorder %s672_s6, %s673_s15  ;;  %p678_p7 = scmp.lt.s32.totalorder %s672_s6, %s986_s3 }
  0x36   : > { %p679_p8 = scmp.lt.s32.totalorder %s677_s23, %s673_s15 }
  0x37   : > { %v300_v4 = vadd.f32 %v299_v3, %v297_v1  ;;  %p675_p5 = pnand %p674_p4, %p863_p9 }
  0x38   : > { %p680_p10 = por %p679_p8, %p678_p7 }
  0x39   : > { %vm301_vm0 = vcmp.ge.f32.partialorder %v300_v4, 1.0  ;;  %p676_p6 = pneg %p675_p5 }
  0x3a   : > { %v508_v6 = vsel %vm301_vm0, 1.0, %v780_v5  ;;  %v305_v7 = vsel %vm301_vm0, 0.0, %v300_v4 }
  0x3b   : > { %304 = vst [vmem:[%s279_s25] sm:$0xff] %v508_v6  ;;  %v308_v9 = vmul.f32 %v305_v7, %v298_v2  ;;  %p681_p13 = pnand %p680_p10, %p676_p6 }
  0x3d   : > { %v309_v10 = vadd.f32 %v509_v8, %v308_v9 }
  0x3f   : > { %vm310_vm1 = vcmp.ge.f32.partialorder %v309_v10, 1.0 }
  0x40   : > { %v510_v11 = vsel %vm310_vm1, 1.0, %v780_v5  ;;  %v315_v12 = vsel %vm310_vm1, 0.0, %v309_v10 }
  0x41   : > { %511 = vst [vmem:[%s279_s25 + $0x8] sm:$0xff] %v510_v11 }
  0x42   : > { %316 = vst [vmem:[%s286_s12] sm:$0xff] %v315_v12 }
  0x43   : > { %684 = shalt.err (!%p681_p13)
}
  0x44   : > { %s781_s25 = smov 128   ;;  %s782_s28 = smov 256  }
  0x45   : > { %s783_s26 = smov 8   ;;  %s323_s10 = scalar_lea.sflag [#allocation10], %s903_s13 }
  0x46   : > { %522 = dma.vmem_to_hbm [thread:$0]  (%p863_p9), %s926_s27, 256, %s340_s20, %s318_s1, %s781_s25, %s782_s28, %s783_s26  }
  0x47   : > { %s699_s11 = sshra.s32 %s932_s16, 4  ;;  %s705_s8 = scalar_lea.hbm %s987_s4, 16  ;;  %s700_s11 = int_to_ptr.hbm [resolvable:$true] %s699_s11 }
  0x48   : > { %s701_s12 = scalar_lea.hbm %s700_s11, 8  ;;  %p706_p3 = scmp.lt.s32.totalorder %s700_s11, %s987_s4 }
  0x49   : > { %p702_p0 = scmp.ne.s32.totalorder %s700_s11, %s701_s12  ;;  %p707_p4 = scmp.lt.s32.totalorder %s705_s8, %s701_s12 }
  0x4b   : > { %p703_p1 = pnand %p702_p0, %p863_p9  ;;  %p708_p5 = por %p707_p4, %p706_p3 }
  0x4d   : > { %p704_p2 = pneg %p703_p1 }
  0x4f   : > { %p709_p6 = pnand %p708_p5, %p704_p2 }
  0x51   : > { %712 = shalt.err (!%p709_p6)
}
  0x52   : > { %523 = dma.vmem_to_hbm [thread:$0]  (%p863_p9), %s930_s14, 128, %s932_s16, %s323_s10  }
  0x53 PF: > { %s368_s13 = sand.u32 1, %s755_s17   ;;  %p534_p7 = pnand %p498_p12, %p870_p11 }
  0x54   : > { %s369_s27 = scalar_lea.sflag [#allocation5], %s368_s13 }
  0x55   : > { %p535_p8 = pneg %p534_p7 }
  0x57   : > { %746 = dma.done.wait (%p535_p8), %s369_s27, 256  }
  0x58   : > { %748 = vsyncadd (%p535_p8), %s369_s27, 4294967040  ;;  %s379_s20 = scalar_lea.sflag [#allocation10], %s368_s13 }
  0x59   : > { %750 = dma.done.wait (%p535_p8), %s379_s20, 128  }
  0x5a   : > { %752 = vsyncadd (%p535_p8), %s379_s20, 4294967168  ;;  %s28_s22 = sadd.s32 1, %s775_s22   ;;  %s995_s17 = smov %s759_s18 }
  0x5b   : > { %p25_p10 = scmp.ge.s32.totalorder %s28_s22, 4   ;;  %s996_s18 = smov %s763_s19 }
  0x5c   : > { %s997_s19 = smov %s868_s30  ;;  %s998_s20 = smov %s771_s21 }
  0x5d   : > { %s999_s21 = smov %s1001_s24  ;;  %27 = sbr.rel (!%p25_p10) target bundleno = 13 (0xd), region = 113 }
  0x62   :  { %385 = vsyncpa [#allocation4], 1 }
  0x63   :  { %387 = vsyncpa [#allocation4 + $0x1], 1 }
  0x64   :  { %388 = vsyncpa [#allocation7], 1 }
  0x65   :  { %390 = vsyncpa [#allocation7 + $0x1], 1 }
  0x66   :  { %391 = vsyncpa [#allocation5], 1 }
  0x67   :  { %393 = vsyncpa [#allocation5 + $0x1], 1 }
  0x68   :  { %394 = vsyncpa [#allocation10], 1 }
  0x69   :  { %396 = vsyncpa [#allocation10 + $0x1], 1 }

</bundles_post_ra>
